<compile_context>
chip_gen: v5e
topology: v5e:2x2
jax: 0.10.0
libtpu: 0.0.40
codegen_flags: <defaults>
</compile_context>

<pallas_src>
import jax
import jax.numpy as jnp
from jax import lax
from jax.experimental import pallas as pl
from jax.experimental.pallas import tpu as pltpu

N_OBS = 11
HIDDEN = 128
EPS = 1e-5
NEG_SLOPE = 0.01  # F.leaky_relu default


def _leaky_relu(x):
    # 2 VALU ops/element; identical to where(x>0, x, s*x) for slope in (0,1).
    return jnp.maximum(x, NEG_SLOPE * x)


def _full_tensor_layer_norm(x):
    # F.layer_norm(x, x.size()): normalize over every element, no affine params.
    # Exact two-pass statistics (matches the reference; no E[x^2]-E[x]^2 cancellation risk).
    mu = jnp.mean(x)
    var = jnp.mean(jnp.square(x - mu))
    return (x - mu) * lax.rsqrt(var + EPS)


def critic_kernel(xt_ref, w1_ref, b1_ref, w2_ref, b2_ref, w3_ref, b3_ref, out_ref):
    # Transposed formulation: batch lives in the lane dimension everywhere.
    #   xt : (K_PAD, B)  matmul dtype (x zero-padded along K and transposed by the wrapper)
    #   w1 : (H, K_PAD)  matmul dtype (PyTorch (out,in) layout, zero-padded along K)
    #   w2 : (H, H)      matmul dtype
    #   w3 : (8, H)      matmul dtype (rows 1..7 zero)
    #   b1, b2 : (H, 1) f32 columns;  b3 : (1, 1) f32
    xt = xt_ref[...]

    # fc_layer: (H, K_PAD) @ (K_PAD, B) -> (H, B), MXU, f32 accumulation.
    h = jnp.dot(w1_ref[...], xt, preferred_element_type=jnp.float32) + b1_ref[...]
    h = _leaky_relu(_full_tensor_layer_norm(h))

    # hidden_layer: (H, H) @ (H, B) -> (H, B), MXU.
    h = jnp.dot(w2_ref[...], h.astype(w2_ref.dtype),
                preferred_element_type=jnp.float32) + b2_ref[...]
    h = _leaky_relu(_full_tensor_layer_norm(h))

    # linear_layer (value head): (8, H) @ (H, B) -> (8, B); only row 0 is real.
    v = jnp.dot(w3_ref[...], h.astype(w3_ref.dtype), preferred_element_type=jnp.float32)
    out_ref[...] = v[0:1, :] + b3_ref[...]          # lane-dense (1, B) store


def critic_forward(x, params, matmul_dtype=jnp.bfloat16):
    """Forward pass.  matmul_dtype=jnp.bfloat16 (default) feeds the MXU natively; accumulation,
    layer norm, biases and activations stay f32.  Use jnp.float32 for strict parity testing."""
    w1, b1, w2, b2, w3, b3 = params   # PyTorch nn.Linear layout: weight (out,in), bias (out,)
    B, n_obs = x.shape
    hidden = w1.shape[0]
    k_pad = ((n_obs + 15) // 16) * 16             # K padded for bf16 sublane packing (11 -> 16)

    # --- wrapper-side layout prep (tiny XLA ops; only the x transpose scales with B) ---
    xt = jnp.pad(x, ((0, 0), (0, k_pad - n_obs))).T.astype(matmul_dtype)        # (K_PAD, B)
    w1_p = jnp.pad(w1, ((0, 0), (0, k_pad - n_obs))).astype(matmul_dtype)       # (H, K_PAD)
    w2_p = w2.astype(matmul_dtype)                                              # (H, H)
    w3_p = jnp.pad(w3, ((0, 8 - w3.shape[0]), (0, 0))).astype(matmul_dtype)     # (8, H)
    b1_c = b1.reshape(hidden, 1).astype(jnp.float32)
    b2_c = b2.reshape(hidden, 1).astype(jnp.float32)
    b3_c = b3.reshape(1, 1).astype(jnp.float32)

    # --- explicit VMEM budget for the single-block design (padded footprint ~2.7 KB per batch row;
    #     budget 4 KB/row for headroom).  Guard so we never silently overshoot scoped VMEM. ---
    est_vmem = 512 * 1024 + B * 4096
    vmem_cap = 48 << 20                            # safe on v5e/v6e (128 MiB) and v7x (64 MiB physical)
    if est_vmem > vmem_cap:
        raise ValueError(
            f"batch {B} exceeds the single-block VMEM budget (~{vmem_cap >> 20} MiB). Split the batch "
            "across calls -- note F.layer_norm over the full tensor couples the batch, so per-call "
            "statistics (and outputs) depend on batch composition.")
    vmem_limit = int(min(max(est_vmem, 16 << 20), vmem_cap))

    itemsize = jnp.dtype(matmul_dtype).itemsize
    flops = 2 * B * (k_pad * hidden + hidden * hidden + 8 * hidden) + 14 * B * hidden
    bytes_accessed = (
        xt.size * itemsize + w1_p.size * itemsize + w2_p.size * itemsize + w3_p.size * itemsize
        + (b1_c.size + b2_c.size + b3_c.size) * 4 + B * 4)

    vmem = pl.BlockSpec(memory_space=pltpu.MemorySpace.VMEM)
    out_t = pl.pallas_call(
        critic_kernel,
        out_shape=jax.ShapeDtypeStruct((1, B), jnp.float32),
        in_specs=[vmem] * 7,
        out_specs=vmem,
        compiler_params=pltpu.CompilerParams(vmem_limit_bytes=vmem_limit),
        cost_estimate=pl.CostEstimate(flops=int(flops), transcendentals=2,
                                      bytes_accessed=int(bytes_accessed)),
    )(xt, w1_p, b1_c, w2_p, b2_c, w3_p, b3_c)

    return out_t.T                                  # (B, 1), matching the PyTorch module


def init_params(key, n_obs=N_OBS, hidden=HIDDEN, sparsity=0.9):
    # Deterministic stand-in for sparse_init(weight, sparsity=0.9) + zero bias, in PyTorch
    # nn.Linear layout: weight (out_features, in_features), bias (out_features,).
    k1, k2, k3, m1, m2, m3 = jax.random.split(key, 6)

    def sparse(k, km, shape):
        w = jax.random.normal(k, shape, dtype=jnp.float32) * 0.1
        mask = jax.random.uniform(km, shape) >= sparsity
        return w * mask.astype(jnp.float32)

    w1 = sparse(k1, m1, (hidden, n_obs))
    w2 = sparse(k2, m2, (hidden, hidden))
    w3 = sparse(k3, m3, (1, hidden))
    b1 = jnp.zeros((hidden,), jnp.float32)
    b2 = jnp.zeros((hidden,), jnp.float32)
    b3 = jnp.zeros((1,), jnp.float32)
    return (w1, b1, w2, b2, w3, b3)


def critic_reference(x, params):
    # Pure-JAX reference mirroring the PyTorch module (f32 everywhere, two-pass LN).
    w1, b1, w2, b2, w3, b3 = params

    def ln(t):
        mu = jnp.mean(t)
        var = jnp.mean(jnp.square(t - mu))
        return (t - mu) * lax.rsqrt(var + EPS)

    h = x @ w1.T + b1
    h = _leaky_relu(ln(h))
    h = h @ w2.T + b2
    h = _leaky_relu(ln(h))
    return h @ w3.T + b3


if __name__ == "__main__":
    key = jax.random.PRNGKey(0)
    kx, kp = jax.random.split(key)

    B = 8
    x = jax.random.normal(kx, (B, N_OBS), dtype=jnp.float32)
    params = init_params(kp)

    ref = critic_reference(x, params)

    # Default path: bf16 matmul operands, f32 accumulation / LN / activations.
    out = jax.block_until_ready(critic_forward(x, params))
    assert out.shape == (B, 1)
    assert jnp.allclose(out, ref, atol=5e-2, rtol=5e-2), (out, ref)

    # Strict-parity f32 path.
    out_f32 = jax.block_until_ready(critic_forward(x, params, matmul_dtype=jnp.float32))
    assert out_f32.shape == (B, 1)
    assert jnp.allclose(out_f32, ref, atol=1e-3, rtol=1e-3), (out_f32, ref)

    print("KERNEL_OK")
</pallas_src>

<mosaic_0001>
module attributes {stable_mosaic.version = 11 : i64} {
  func.func @critic_kernel(%arg0: memref<16x8xbf16, #tpu.memory_space<vmem>>, %arg1: memref<128x16xbf16, #tpu.memory_space<vmem>>, %arg2: memref<128x1xf32, #tpu.memory_space<vmem>>, %arg3: memref<128x128xbf16, #tpu.memory_space<vmem>>, %arg4: memref<128x1xf32, #tpu.memory_space<vmem>>, %arg5: memref<8x128xbf16, #tpu.memory_space<vmem>>, %arg6: memref<1x1xf32, #tpu.memory_space<vmem>>, %arg7: memref<1x8xf32, #tpu.memory_space<vmem>>) attributes {dimension_semantics = [], scalar_prefetch = 0 : i64, scratch_operands = 0 : i64, tpu.core_type = #tpu.core_type<tc>} {
    %c0 = arith.constant 0 : index
    %c0_0 = arith.constant 0 : index
    %0 = vector.load %arg0[%c0, %c0_0] : memref<16x8xbf16, #tpu.memory_space<vmem>>, vector<16x8xbf16>
    %c0_1 = arith.constant 0 : index
    %c0_2 = arith.constant 0 : index
    %1 = vector.load %arg1[%c0_1, %c0_2] : memref<128x16xbf16, #tpu.memory_space<vmem>>, vector<128x16xbf16>
    %cst = arith.constant dense<0.000000e+00> : vector<128x8xf32>
    %2 = tpu.matmul %1, %0, %cst {dimension_numbers = #tpu.dot_dimension_numbers<[1], [0], [0], [1], [0, 0, 1, 1], [], []>} : vector<128x16xbf16>, vector<16x8xbf16>, vector<128x8xf32> -> vector<128x8xf32>
    %c0_3 = arith.constant 0 : index
    %c0_4 = arith.constant 0 : index
    %3 = vector.load %arg2[%c0_3, %c0_4] : memref<128x1xf32, #tpu.memory_space<vmem>>, vector<128x1xf32>
    %4 = vector.broadcast %3 : vector<128x1xf32> to vector<128x8xf32>
    %5 = arith.addf %2, %4 : vector<128x8xf32>
    %6 = vector.shape_cast %5 : vector<128x8xf32> to vector<1x128x8xf32>
    %cst_5 = arith.constant dense<0.000000e+00> : vector<1xf32>
    %7 = vector.multi_reduction <add>, %6, %cst_5 [1, 2] : vector<1x128x8xf32> to vector<1xf32>
    %8 = vector.shape_cast %7 : vector<1xf32> to vector<1x1x1xf32>
    %9 = vector.extract %8[0, 0, 0] : f32 from vector<1x1x1xf32>
    %cst_6 = arith.constant 1.024000e+03 : f32
    %10 = arith.divf %9, %cst_6 : f32
    %11 = vector.broadcast %10 : f32 to vector<128x8xf32>
    %12 = arith.subf %5, %11 : vector<128x8xf32>
    %13 = arith.mulf %12, %12 : vector<128x8xf32>
    %14 = vector.shape_cast %13 : vector<128x8xf32> to vector<1x128x8xf32>
    %cst_7 = arith.constant dense<0.000000e+00> : vector<1xf32>
    %15 = vector.multi_reduction <add>, %14, %cst_7 [1, 2] : vector<1x128x8xf32> to vector<1xf32>
    %16 = vector.shape_cast %15 : vector<1xf32> to vector<1x1x1xf32>
    %17 = vector.extract %16[0, 0, 0] : f32 from vector<1x1x1xf32>
    %cst_8 = arith.constant 1.024000e+03 : f32
    %18 = arith.divf %17, %cst_8 : f32
    %19 = vector.broadcast %10 : f32 to vector<128x8xf32>
    %20 = arith.subf %5, %19 : vector<128x8xf32>
    %cst_9 = arith.constant 9.99999974E-6 : f32
    %21 = arith.addf %18, %cst_9 : f32
    %22 = math.rsqrt %21 : f32
    %23 = vector.broadcast %22 : f32 to vector<128x8xf32>
    %24 = arith.mulf %20, %23 : vector<128x8xf32>
    %cst_10 = arith.constant 0.00999999977 : f32
    %25 = vector.broadcast %cst_10 : f32 to vector<128x8xf32>
    %26 = arith.mulf %25, %24 : vector<128x8xf32>
    %27 = arith.maximumf %24, %26 : vector<128x8xf32>
    %c0_11 = arith.constant 0 : index
    %c0_12 = arith.constant 0 : index
    %28 = vector.load %arg3[%c0_11, %c0_12] : memref<128x128xbf16, #tpu.memory_space<vmem>>, vector<128x128xbf16>
    %29 = arith.truncf %27 : vector<128x8xf32> to vector<128x8xbf16>
    %cst_13 = arith.constant dense<0.000000e+00> : vector<128x8xf32>
    %30 = tpu.matmul %28, %29, %cst_13 {dimension_numbers = #tpu.dot_dimension_numbers<[1], [0], [0], [1], [0, 0, 1, 1], [], []>} : vector<128x128xbf16>, vector<128x8xbf16>, vector<128x8xf32> -> vector<128x8xf32>
    %c0_14 = arith.constant 0 : index
    %c0_15 = arith.constant 0 : index
    %31 = vector.load %arg4[%c0_14, %c0_15] : memref<128x1xf32, #tpu.memory_space<vmem>>, vector<128x1xf32>
    %32 = vector.broadcast %31 : vector<128x1xf32> to vector<128x8xf32>
    %33 = arith.addf %30, %32 : vector<128x8xf32>
    %34 = vector.shape_cast %33 : vector<128x8xf32> to vector<1x128x8xf32>
    %cst_16 = arith.constant dense<0.000000e+00> : vector<1xf32>
    %35 = vector.multi_reduction <add>, %34, %cst_16 [1, 2] : vector<1x128x8xf32> to vector<1xf32>
    %36 = vector.shape_cast %35 : vector<1xf32> to vector<1x1x1xf32>
    %37 = vector.extract %36[0, 0, 0] : f32 from vector<1x1x1xf32>
    %cst_17 = arith.constant 1.024000e+03 : f32
    %38 = arith.divf %37, %cst_17 : f32
    %39 = vector.broadcast %38 : f32 to vector<128x8xf32>
    %40 = arith.subf %33, %39 : vector<128x8xf32>
    %41 = arith.mulf %40, %40 : vector<128x8xf32>
    %42 = vector.shape_cast %41 : vector<128x8xf32> to vector<1x128x8xf32>
    %cst_18 = arith.constant dense<0.000000e+00> : vector<1xf32>
    %43 = vector.multi_reduction <add>, %42, %cst_18 [1, 2] : vector<1x128x8xf32> to vector<1xf32>
    %44 = vector.shape_cast %43 : vector<1xf32> to vector<1x1x1xf32>
    %45 = vector.extract %44[0, 0, 0] : f32 from vector<1x1x1xf32>
    %cst_19 = arith.constant 1.024000e+03 : f32
    %46 = arith.divf %45, %cst_19 : f32
    %47 = vector.broadcast %38 : f32 to vector<128x8xf32>
    %48 = arith.subf %33, %47 : vector<128x8xf32>
    %cst_20 = arith.constant 9.99999974E-6 : f32
    %49 = arith.addf %46, %cst_20 : f32
    %50 = math.rsqrt %49 : f32
    %51 = vector.broadcast %50 : f32 to vector<128x8xf32>
    %52 = arith.mulf %48, %51 : vector<128x8xf32>
    %cst_21 = arith.constant 0.00999999977 : f32
    %53 = vector.broadcast %cst_21 : f32 to vector<128x8xf32>
    %54 = arith.mulf %53, %52 : vector<128x8xf32>
    %55 = arith.maximumf %52, %54 : vector<128x8xf32>
    %c0_22 = arith.constant 0 : index
    %c0_23 = arith.constant 0 : index
    %56 = vector.load %arg5[%c0_22, %c0_23] : memref<8x128xbf16, #tpu.memory_space<vmem>>, vector<8x128xbf16>
    %57 = arith.truncf %55 : vector<128x8xf32> to vector<128x8xbf16>
    %cst_24 = arith.constant dense<0.000000e+00> : vector<8x8xf32>
    %58 = tpu.matmul %56, %57, %cst_24 {dimension_numbers = #tpu.dot_dimension_numbers<[1], [0], [0], [1], [0, 0, 1, 1], [], []>} : vector<8x128xbf16>, vector<128x8xbf16>, vector<8x8xf32> -> vector<8x8xf32>
    %59 = vector.extract_strided_slice %58 {offsets = [0, 0], sizes = [1, 8], strides = [1, 1]} : vector<8x8xf32> to vector<1x8xf32>
    %c0_25 = arith.constant 0 : index
    %c0_26 = arith.constant 0 : index
    %60 = vector.load %arg6[%c0_25, %c0_26] : memref<1x1xf32, #tpu.memory_space<vmem>>, vector<1x1xf32>
    %61 = vector.broadcast %60 : vector<1x1xf32> to vector<1x8xf32>
    %62 = arith.addf %59, %61 : vector<1x8xf32>
    %c0_27 = arith.constant 0 : index
    %c0_28 = arith.constant 0 : index
    %63 = vector.load %arg7[%c0_27, %c0_28] : memref<1x8xf32, #tpu.memory_space<vmem>>, vector<1x8xf32>
    tpu.vector_store %arg7[%c0_27, %c0_28], %62 {strides = array<i32>} : memref<1x8xf32, #tpu.memory_space<vmem>>, vector<1x8xf32>,
    return
  }
}

</mosaic_0001>

<bundles_post_ra>
// kernel: tpu_custom_call.1
= control target key start
LH: loop header
LB: loop body
LE: loop exit
PB: predicated region body
PF: predicated region fallthrough
CT: control target
= control target key end

     0   :  { %s1595_s0 = inlined_call_operand.vmem [shape: bf16[16,8], index: 0, kind: input, shape index: {}]   ;;  %s1596_s1 = inlined_call_operand.vmem [shape: bf16[128,16], index: 1, kind: input, shape index: {}]   ;;  %s1597_s2 = inlined_call_operand.vmem [shape: f32[128,1], index: 2, kind: input, shape index: {}]   ;;  %s1598_s3 = inlined_call_operand.vmem [shape: bf16[128,128], index: 3, kind: input, shape index: {}]   ;;  %s1599_s4 = inlined_call_operand.vmem [shape: f32[128,1], index: 4, kind: input, shape index: {}]   ;;  %s1600_s5 = inlined_call_operand.vmem [shape: bf16[8,128], index: 5, kind: input, shape index: {}]   ;;  %s1601_s6 = inlined_call_operand.<no memory space> [shape: f32[1,1], index: 6, kind: input, shape index: {}]   ;;  %s1602_s7 = inlined_call_operand.hbm [shape: f32[1,8], index: 7, kind: output, shape index: {}]  }
   0x1   :  { %v12_v0 = vstv %s1601_s6 }
   0x2   :  { %13 = vst [vmem:[#allocation2] sm:$0x1] %v12_v0 }
   0x3   :  { %v48_v1 = vld [vmem:[%s1597_s2] sm:$0xff]  ;;  %v1070_v3 = vmov 0   ;;  %vm190_vm0 = vcmask 130048   ;;  %v999_v5 = vld [vmem:[%s1596_s1 + $0x30] sm:$0xff] }
   0x4   :  { %v992_v2 = vld [vmem:[%s1595_s0] sm:$0xff]  ;;  %1035 = vset.pattern.permute.xlu0 %v1070_v3  ;;  %1036 = vset.pattern.permute.xlu1 %v1070_v3  ;;  %v50_v6 = vld [vmem:[%s1597_s2 + $0x10] sm:$0xff] }
   0x5   :  { %v993_v4 = vld [vmem:[%s1596_s1] sm:$0xff]  ;;  %66 = vperm.xlu0 %1035, %v48_v1   ;;  %222 = vmatpush.bf16.msra.mxu0 %v992_v2 }
   0x6   :  { %1009 = vmatpush.bf16.msra.mxu2 %v992_v2  ;;  %76 = vperm.xlu1 %1036, %v50_v6  }
   0x7   :  { %14 = vsyncpa [#allocation4], 0  ;;  %1037 = vset.pattern.permute.xlu2 %v1070_v3  ;;  %v49_v7 = vld [vmem:[%s1597_s2 + $0x8] sm:$0xff]  ;;  %v51_v8 = vld [vmem:[%s1597_s2 + $0x18] sm:$0xff]  ;;  %vm264_vm1 = vcmask 64512   ;;  %s1072_s9 = smov [#allocation3]  }
   0x8   :  { %952 = vmatmul.msk.bf16.vlgmr.msra.gmra.mxu0 %vm190_vm0, %v993_v4  ;;  %v54_v9 = vld [vmem:[%s1597_s2 + $0x30] sm:$0xff]  ;;  %v994_v10 = vld [vmem:[%s1596_s1 + $0x8] sm:$0xff]  ;;  %v1000_v11 = vld [vmem:[%s1596_s1 + $0x38] sm:$0xff]  ;;  %vm898_vm9 = vcmask 57344  }
   0x9   :  { %958 = vmatmul.msk.bf16.vlgmr.msra.gmra.mxu2 %vm190_vm0, %v999_v5  ;;  %v57_v12 = vld [vmem:[%s1597_s2 + $0x48] sm:$0xff]  ;;  %v55_v13 = vld [vmem:[%s1597_s2 + $0x38] sm:$0xff]  ;;  %v60_v14 = vld [vmem:[%s1597_s2 + $0x60] sm:$0xff] }
   0xa   :  { %v995_v15 = vld [vmem:[%s1596_s1 + $0x10] sm:$0xff]  ;;  %v52_v17 = vld [vmem:[%s1597_s2 + $0x20] sm:$0xff]  ;;  %v63_v18 = vld [vmem:[%s1597_s2 + $0x78] sm:$0xff] }
   0xb   :  { %v58_v16 = vld [vmem:[%s1597_s2 + $0x50] sm:$0xff]  ;;  %86 = vperm.xlu2 %1037, %v52_v17   ;;  %v61_v19 = vld [vmem:[%s1597_s2 + $0x68] sm:$0xff]  ;;  %v482_v21 = vld [vmem:[%s1599_s4] sm:$0xff] }
   0xc   :  { %v53_v20 = vld [vmem:[%s1597_s2 + $0x28] sm:$0xff]  ;;  %v996_v22 = vld [vmem:[%s1596_s1 + $0x18] sm:$0xff]  ;;  %v56_v23 = vld [vmem:[%s1597_s2 + $0x40] sm:$0xff] }
   0xd   :  { %71 = vperm.xlu0 %1035, %v49_v7   ;;  %v483_v24 = vld [vmem:[%s1599_s4 + $0x8] sm:$0xff]  ;;  %v59_v25 = vld [vmem:[%s1597_s2 + $0x58] sm:$0xff]  ;;  %v484_v26 = vld [vmem:[%s1599_s4 + $0x10] sm:$0xff] }
   0xe   :  { %81 = vperm.xlu1 %1036, %v51_v8   ;;  %v997_v27 = vld [vmem:[%s1596_s1 + $0x20] sm:$0xff]  ;;  %v62_v28 = vld [vmem:[%s1597_s2 + $0x70] sm:$0xff]  ;;  %v485_v29 = vld [vmem:[%s1599_s4 + $0x18] sm:$0xff] }
   0xf   :  { %v486_v30 = vld [vmem:[%s1599_s4 + $0x20] sm:$0xff]  ;;  %v998_v31 = vld [vmem:[%s1596_s1 + $0x28] sm:$0xff]  ;;  %v489_v32 = vld [vmem:[%s1599_s4 + $0x38] sm:$0xff] }
  0x10   :  { %v490_v33 = vld [vmem:[%s1599_s4 + $0x40] sm:$0xff]  ;;  %v491_v34 = vld [vmem:[%s1599_s4 + $0x48] sm:$0xff]  ;;  %v497_v36 = vld [vmem:[%s1599_s4 + $0x78] sm:$0xff] }
  0x11   :  { %v494_v35 = vld [vmem:[%s1599_s4 + $0x60] sm:$0xff] }
  0x12   :  { %v890_v37 = vld [vmem:[#allocation2] sm:$0x1] }
  0x13   :  { %91 = vperm.xlu2 %1037, %v53_v20  }
  0x15   :  { %96 = vperm.xlu0 %1035, %v54_v9  }
  0x16   :  { %101 = vperm.xlu1 %1036, %v55_v13  }
  0x18   :  { %953 = vmatmul.msk.bf16.gmra.mxu0 %vm190_vm0, %v994_v10 }
  0x19   :  { %959 = vmatmul.msk.bf16.gmra.mxu2 %vm190_vm0, %v1000_v11 }
  0x1b   :  { %106 = vperm.xlu2 %1037, %v56_v23  }
  0x1d   :  { %111 = vperm.xlu0 %1035, %v57_v12  }
  0x1e   :  { %116 = vperm.xlu1 %1036, %v58_v16  }
  0x23   :  { %121 = vperm.xlu2 %1037, %v59_v25  }
  0x25   :  { %126 = vperm.xlu0 %1035, %v60_v14  }
  0x26   :  { %131 = vperm.xlu1 %1036, %v61_v19  }
  0x28   :  { %954 = vmatmul.msk.bf16.gmra.mxu0 %vm190_vm0, %v995_v15 }
  0x2b   :  { %136 = vperm.xlu2 %1037, %v62_v28  }
  0x2d   :  { %141 = vperm.xlu0 %1035, %v63_v18  }
  0x35   :  { %500 = vperm.xlu0 %1035, %v482_v21  }
  0x38   :  { %955 = vmatmul.msk.bf16.gmra.mxu0 %vm190_vm0, %v996_v22 }
  0x3d   :  { %505 = vperm.xlu0 %1035, %v483_v24  }
  0x45   :  { %510 = vperm.xlu0 %1035, %v484_v26  }
  0x48   :  { %956 = vmatmul.msk.bf16.gmra.mxu0 %vm190_vm0, %v997_v27 }
  0x4d   :  { %515 = vperm.xlu0 %1035, %v485_v29  }
  0x55   :  { %520 = vperm.xlu0 %1035, %v486_v30  }
  0x58   :  { %957 = vmatmul.msk.bf16.gmra.mxu0 %vm190_vm0, %v998_v31 }
  0x5d   :  { %535 = vperm.xlu0 %1035, %v489_v32  }
  0x65   :  { %540 = vperm.xlu0 %1035, %v490_v33   ;;  %v87_v47 = vpop.permute.xlu2 %86 }
  0x6d   :  { %545 = vperm.xlu0 %1035, %v491_v34   ;;  %v92_v51 = vpop.permute.xlu2 %91 }
  0x75   :  { %560 = vperm.xlu0 %1035, %v494_v35   ;;  %v107_v61 = vpop.permute.xlu2 %106 }
  0x77   :  { %v67_v44 = vpop.permute.xlu0 %66 }
  0x78   :  { %v77_v46 = vpop.permute.xlu1 %76 }
  0x7d   :  { %575 = vperm.xlu0 %1035, %v497_v36   ;;  %v122_v18 = vpop.permute.xlu2 %121 }
  0x7f   :  { %v72_v48 = vpop.permute.xlu0 %71 }
  0x80   :  { %v82_v50 = vpop.permute.xlu1 %81 }
  0x85   :  { %893 = vperm.xlu0 %1035, %v890_v37   ;;  %v224_v38 = vpop.f32.mrf.mxu0  ;;  %v137_v36 = vpop.permute.xlu2 %136 }
  0x86   :  { %v1231_v56 = vadd.f32 %v224_v38, %v67_v44 }
  0x87   :  { %v97_v53 = vpop.permute.xlu0 %96 }
  0x88   :  { %v102_v58 = vpop.permute.xlu1 %101  ;;  %v265_v62 = vsel %vm264_vm1, %v1231_v56, 0.0 }
  0x8c   :  { %v254_v52 = vpop.f32.mrf.mxu2 }
  0x8d   :  { %v226_v39 = vpop.f32.mrf.mxu0 }
  0x8e   :  { %v1229_v55 = vadd.f32 %v226_v39, %v72_v48 }
  0x8f   :  { %v112_v6 = vpop.permute.xlu0 %111 }
  0x90   :  { %v266_v59 = vsel %vm264_vm1, %v1229_v55, 0.0  ;;  %v117_v14 = vpop.permute.xlu1 %116 }
  0x91   :  { %v267_v1 = vadd.f32 %v266_v59, %v265_v62  ;;  %v1071_v59 = vmov 1024.0  }
  0x92   :  { %1038 = vrcp.f32 %v1071_v59 }
  0x94   :  { %v256_v2 = vpop.f32.mrf.mxu2 }
  0x95   :  { %v229_v40 = vpop.f32.mrf.mxu0 }
  0x96   :  { %v1233_v57 = vadd.f32 %v229_v40, %v77_v46 }
  0x97   :  { %v127_v26 = vpop.permute.xlu0 %126 }
  0x98   :  { %v268_v63 = vsel %vm264_vm1, %v1233_v57, 0.0  ;;  %v132_v31 = vpop.permute.xlu1 %131  ;;  %v1273_v34 = vadd.f32 %v254_v52, %v127_v26 }
  0x99   :  { %v269_v7 = vadd.f32 %v268_v63, %v267_v1  ;;  %v1277_v38 = vadd.f32 %v256_v2, %v132_v31 }
  0x9c   :  { %v259_v23 = vpop.f32.mrf.mxu2 }
  0x9d   :  { %v231_v41 = vpop.f32.mrf.mxu0 }
  0x9e   :  { %v1237_v60 = vadd.f32 %v231_v41, %v82_v50 }
  0x9f   :  { %v142_v44 = vpop.permute.xlu0 %141 }
  0xa0   :  { %v270_v4 = vsel %vm264_vm1, %v1237_v60, 0.0 }
  0xa1   :  { %v271_v10 = vadd.f32 %v270_v4, %v269_v7 }
  0xa4   :  { %v261_v40 = vpop.f32.mrf.mxu2 }
  0xa5   :  { %v234_v42 = vpop.f32.mrf.mxu0  ;;  %v1285_v46 = vadd.f32 %v261_v40, %v142_v44 }
  0xa6   :  { %v1243_v0 = vadd.f32 %v234_v42, %v87_v47  ;;  %v288_v42 = vsel %vm264_vm1, %v1273_v34, 0.0  ;;  %v290_v47 = vsel %vm264_vm1, %v1277_v38, 0.0 }
  0xa8   :  { %v272_v8 = vsel %vm264_vm1, %v1243_v0, 0.0 }
  0xa9   :  { %v273_v13 = vadd.f32 %v272_v8, %v271_v10 }
  0xad   :  { %v236_v43 = vpop.f32.mrf.mxu0 }
  0xae   :  { %v1247_v5 = vadd.f32 %v236_v43, %v92_v51  ;;  %v1283_v43 = vadd.f32 %v259_v23, %v137_v36  ;;  %v294_v51 = vsel %vm264_vm1, %v1285_v46, 0.0 }
  0xb0   :  { %v274_v11 = vsel %vm264_vm1, %v1247_v5, 0.0 }
  0xb1   :  { %v275_v17 = vadd.f32 %v274_v11, %v273_v13 }
  0xb5   :  { %v239_v45 = vpop.f32.mrf.mxu0 }
  0xb6   :  { %v1251_v9 = vadd.f32 %v239_v45, %v97_v53  ;;  %v488_v53 = vld [vmem:[%s1599_s4 + $0x30] sm:$0xff] }
  0xb8   :  { %v276_v15 = vsel %vm264_vm1, %v1251_v9, 0.0 }
  0xb9   :  { %v277_v22 = vadd.f32 %v276_v15, %v275_v17 }
  0xbd   :  { %v241_v49 = vpop.f32.mrf.mxu0 }
  0xbe   :  { %v1255_v12 = vadd.f32 %v241_v49, %v102_v58  ;;  %v292_v49 = vsel %vm264_vm1, %v1283_v43, 0.0  ;;  %v496_v58 = vld [vmem:[%s1599_s4 + $0x70] sm:$0xff] }
  0xc0   :  { %v278_v20 = vsel %vm264_vm1, %v1255_v12, 0.0 }
  0xc1   :  { %v279_v27 = vadd.f32 %v278_v20, %v277_v22 }
  0xc5   :  { %v244_v54 = vpop.f32.mrf.mxu0 }
  0xc6   :  { %v1259_v16 = vadd.f32 %v244_v54, %v107_v61  ;;  %v493_v54 = vld [vmem:[%s1599_s4 + $0x58] sm:$0xff]  ;;  %v1039_v61 = vpop.eup %1038 }
  0xc7   :  { %v306_v62 = vmul.f32 1024.0, %v1039_v61  ;;  %vm310_vm2 = vweird.f32 %v1039_v61 }
  0xc8   :  { %v280_v24 = vsel %vm264_vm1, %v1259_v16, 0.0 }
  0xc9   :  { %v281_v29 = vadd.f32 %v280_v24, %v279_v27  ;;  %v307_v63 = vsub.f32 1.0, %v306_v62 }
  0xcb   :  { %v308_v4 = vmul.f32 %v1039_v61, %v307_v63 }
  0xcd   :  { %v246_v3 = vpop.f32.mrf.mxu0  ;;  %v309_v8 = vadd.f32 %v1039_v61, %v308_v4 }
  0xce   :  { %v1263_v21 = vadd.f32 %v246_v3, %v112_v6 }
  0xcf   :  { %v311_v13 = vsel %vm310_vm2, %v1039_v61, %v309_v8 }
  0xd0   :  { %v282_v28 = vsel %vm264_vm1, %v1263_v21, 0.0 }
  0xd1   :  { %v283_v32 = vadd.f32 %v282_v28, %v281_v29 }
  0xd5   :  { %v249_v19 = vpop.f32.mrf.mxu0 }
  0xd6   :  { %v1267_v25 = vadd.f32 %v249_v19, %v117_v14 }
  0xd8   :  { %v284_v30 = vsel %vm264_vm1, %v1267_v25, 0.0 }
  0xd9   :  { %v285_v37 = vadd.f32 %v284_v30, %v283_v32 }
  0xdd   :  { %v251_v33 = vpop.f32.mrf.mxu0 }
  0xde   :  { %v1275_v35 = vadd.f32 %v251_v33, %v122_v18 }
  0xe0   :  { %v286_v39 = vsel %vm264_vm1, %v1275_v35, 0.0 }
  0xe1   :  { %v287_v41 = vadd.f32 %v286_v39, %v285_v37 }
  0xe3   :  { %v289_v45 = vadd.f32 %v288_v42, %v287_v41 }
  0xe5   :  { %v291_v48 = vadd.f32 %v290_v47, %v289_v45 }
  0xe7   :  { %v293_v50 = vadd.f32 %v292_v49, %v291_v48 }
  0xe9   :  { %v295_v52 = vadd.f32 %v294_v51, %v293_v50 }
  0xeb   :  { %296 = vadd.xlane.f32.xlu1 %v295_v52 }
 0x104   :  { %530 = vperm.xlu1 %1036, %v488_v53  }
 0x10c   :  { %555 = vperm.xlu1 %1036, %v493_v54  }
 0x114   :  { %570 = vperm.xlu1 %1036, %v496_v58  }
 0x15e   :  { %v297_v1 = vpop.xlane.xlu1 %296 }
 0x15f   :  { %v298_v2 = vrot.slane %v297_v1, 4 }
 0x161   :  { %v299_v3 = vadd.f32 %v298_v2, %v297_v1 }
 0x163   :  { %v300_v6 = vrot.slane %v299_v3, 2 }
 0x165   :  { %v301_v7 = vadd.f32 %v300_v6, %v299_v3 }
 0x167   :  { %v302_v10 = vrot.slane %v301_v7, 1 }
 0x169   :  { %v303_v11 = vadd.f32 %v302_v10, %v301_v7 }
 0x16b   :  { %1018 = vpush %v303_v11 }
 0x16c   :  { %1020 = vpush %v311_v13 }
 0x19c   :  { %s1019_s25 = spop %1018 }
 0x19d   :  { %s1302_s26 = spop %1020 }
 0x19e   :  { %s313_s27 = smul.f32 %s1302_s26, %s1019_s25 }
 0x1a0   :  { %v314_v14 = vstv %s313_s27 }
 0x1a1   :  { %v1306_v15 = vsub.f32 %v1231_v56, %v314_v14  ;;  %v1309_v17 = vsub.f32 %v1229_v55, %v314_v14  ;;  %v1312_v18 = vsub.f32 %v1233_v57, %v314_v14  ;;  %v1315_v19 = vsub.f32 %v1237_v60, %v314_v14 }
 0x1a2   :  { %v1322_v23 = vsub.f32 %v1243_v0, %v314_v14  ;;  %v1327_v55 = vsub.f32 %v1247_v5, %v314_v14  ;;  %v1334_v27 = vsub.f32 %v1251_v9, %v314_v14  ;;  %v1340_v5 = vsub.f32 %v1255_v12, %v314_v14 }
 0x1a3   :  { %v331_v20 = vmul.f32 %v1306_v15, %v1306_v15  ;;  %v332_v22 = vmul.f32 %v1309_v17, %v1309_v17  ;;  %v333_v56 = vmul.f32 %v1312_v18, %v1312_v18  ;;  %v334_v57 = vmul.f32 %v1315_v19, %v1315_v19 }
 0x1a4   :  { %v335_v0 = vmul.f32 %v1322_v23, %v1322_v23  ;;  %v336_v30 = vmul.f32 %v1327_v55, %v1327_v55  ;;  %v1346_v33 = vsub.f32 %v1259_v16, %v314_v14  ;;  %v337_v9 = vmul.f32 %v1334_v27, %v1334_v27 }
 0x1a5   :  { %v347_v60 = vsel %vm264_vm1, %v331_v20, 0.0  ;;  %v348_v24 = vsel %vm264_vm1, %v332_v22, 0.0  ;;  %v350_v28 = vsel %vm264_vm1, %v333_v56, 0.0  ;;  %v352_v31 = vsel %vm264_vm1, %v334_v57, 0.0  ;;  %v495_v22 = vld [vmem:[%s1599_s4 + $0x68] sm:$0xff] }
 0x1a6   :  { %v349_v26 = vadd.f32 %v348_v24, %v347_v60  ;;  %v354_v36 = vsel %vm264_vm1, %v335_v0, 0.0  ;;  %v1352_v39 = vsub.f32 %v1263_v21, %v314_v14  ;;  %v338_v12 = vmul.f32 %v1340_v5, %v1340_v5 }
 0x1a7   :  { %v356_v40 = vsel %vm264_vm1, %v336_v30, 0.0  ;;  %v1358_v42 = vsub.f32 %v1267_v25, %v314_v14  ;;  %v339_v16 = vmul.f32 %v1346_v33, %v1346_v33  ;;  %v358_v44 = vsel %vm264_vm1, %v337_v9, 0.0 }
 0x1a8   :  { %v351_v29 = vadd.f32 %v350_v28, %v349_v26  ;;  %v1364_v47 = vsub.f32 %v1275_v35, %v314_v14  ;;  %v340_v21 = vmul.f32 %v1352_v39, %v1352_v39  ;;  %v360_v48 = vsel %vm264_vm1, %v338_v12, 0.0 }
 0x1a9   :  { %v327_v50 = vsub.f32 %v1273_v34, %v314_v14  ;;  %v341_v25 = vmul.f32 %v1358_v42, %v1358_v42  ;;  %v362_v51 = vsel %vm264_vm1, %v339_v16, 0.0  ;;  %v328_v53 = vsub.f32 %v1277_v38, %v314_v14 }
 0x1aa   :  { %v353_v32 = vadd.f32 %v352_v31, %v351_v29  ;;  %v342_v35 = vmul.f32 %v1364_v47, %v1364_v47  ;;  %v364_v54 = vsel %vm264_vm1, %v340_v21, 0.0  ;;  %v329_v59 = vsub.f32 %v1283_v43, %v314_v14 }
 0x1ab   :  { %v343_v61 = vmul.f32 %v327_v50, %v327_v50  ;;  %v366_v62 = vsel %vm264_vm1, %v341_v25, 0.0  ;;  %v330_v63 = vsub.f32 %v1285_v46, %v314_v14  ;;  %v344_v1 = vmul.f32 %v328_v53, %v328_v53  ;;  %v487_v46 = vld [vmem:[%s1599_s4 + $0x28] sm:$0xff]  ;;  %v492_v14 = vld [vmem:[%s1599_s4 + $0x50] sm:$0xff] }
 0x1ac   :  { %v355_v37 = vadd.f32 %v354_v36, %v353_v32  ;;  %v368_v2 = vsel %vm264_vm1, %v342_v35, 0.0  ;;  %v345_v4 = vmul.f32 %v329_v59, %v329_v59 }
 0x1ad   :  { %v370_v38 = vsel %vm264_vm1, %v343_v61, 0.0  ;;  %v346_v7 = vmul.f32 %v330_v63, %v330_v63  ;;  %v372_v8 = vsel %vm264_vm1, %v344_v1, 0.0 }
 0x1ae   :  { %v357_v41 = vadd.f32 %v356_v40, %v355_v37  ;;  %v374_v43 = vsel %vm264_vm1, %v345_v4, 0.0 }
 0x1af   :  { %v376_v13 = vsel %vm264_vm1, %v346_v7, 0.0 }
 0x1b0   :  { %v359_v45 = vadd.f32 %v358_v44, %v357_v41 }
 0x1b2   :  { %v361_v49 = vadd.f32 %v360_v48, %v359_v45 }
 0x1b4   :  { %v363_v52 = vadd.f32 %v362_v51, %v361_v49 }
 0x1b6   :  { %v365_v58 = vadd.f32 %v364_v54, %v363_v52 }
 0x1b8   :  { %v367_v34 = vadd.f32 %v366_v62, %v365_v58 }
 0x1ba   :  { %v369_v3 = vadd.f32 %v368_v2, %v367_v34 }
 0x1bc   :  { %v371_v6 = vadd.f32 %v370_v38, %v369_v3 }
 0x1be   :  { %v373_v10 = vadd.f32 %v372_v8, %v371_v6 }
 0x1c0   :  { %v375_v11 = vadd.f32 %v374_v43, %v373_v10 }
 0x1c2   :  { %v377_v20 = vadd.f32 %v376_v13, %v375_v11 }
 0x1c4   :  { %378 = vadd.xlane.f32.xlu2 %v377_v20 }
 0x1dc   :  { %525 = vperm.xlu2 %1037, %v487_v46  }
 0x1e4   :  { %550 = vperm.xlu2 %1037, %v492_v14  }
 0x1ec   :  { %565 = vperm.xlu2 %1037, %v495_v22  }
 0x237   :  { %v379_v56 = vpop.xlane.xlu2 %378 }
 0x238   :  { %v380_v57 = vrot.slane %v379_v56, 4 }
 0x23a   :  { %v381_v60 = vadd.f32 %v380_v57, %v379_v56 }
 0x23c   :  { %v382_v24 = vrot.slane %v381_v60, 2 }
 0x23e   :  { %v383_v26 = vadd.f32 %v382_v24, %v381_v60 }
 0x240   :  { %v384_v0 = vrot.slane %v383_v26, 1 }
 0x242   :  { %v385_v28 = vadd.f32 %v384_v0, %v383_v26 }
 0x244   :  { %1022 = vpush %v385_v28 }
 0x275   :  { %s1023_s10 = spop %1022 }
 0x276   :  { %s395_s11 = smul.f32 %s1023_s10, %s1302_s26  ;;  %s905_s10 = sshll.u32 %s1072_s9, 4  ;;  %s906_s10 = int_to_ptr.vmem [resolvable:$true] %s905_s10 }
 0x278   :  { %s396_s2 = sadd.f32 1e-05, %s395_s11 }
 0x27a   :  { %v397_v29 = vstv %s396_s2 }
 0x27b   :  { %1040 = vrsqrt.f32 %v397_v29  ;;  %vm404_vm4 = vweird.f32 %v397_v29 }
 0x281   :  { %v1041_v30 = vpop.eup %1040 }
 0x282   :  { %v399_v31 = vmul.f32 %v1041_v30, %v397_v29  ;;  %vm405_vm3 = vweird.f32 %v1041_v30 }
 0x283   :  { %vm406_vm5 = vmor %vm404_vm4, %vm405_vm3 }
 0x284   :  { %v400_v32 = vmul.f32 %v1041_v30, %v399_v31  ;;  %v1005_v31 = vld [vmem:[%s1598_s3 + $0x20] sm:$0xff] }
 0x286   :  { %v401_v9 = vmul.f32 0.5, %v400_v32  ;;  %v1002_v32 = vld [vmem:[%s1598_s3 + $0x8] sm:$0xff] }
 0x288   :  { %v402_v36 = vsub.f32 1.5, %v401_v9  ;;  %v1006_v9 = vld [vmem:[%s1598_s3 + $0x28] sm:$0xff] }
 0x28a   :  { %v403_v37 = vmul.f32 %v1041_v30, %v402_v36  ;;  %v1003_v36 = vld [vmem:[%s1598_s3 + $0x10] sm:$0xff] }
 0x28c   :  { %v407_v12 = vsel %vm406_vm5, %v1041_v30, %v403_v37  ;;  %v1007_v37 = vld [vmem:[%s1598_s3 + $0x30] sm:$0xff] }
 0x28d   :  { %1024 = vpush %v407_v12  ;;  %v1004_v12 = vld [vmem:[%s1598_s3 + $0x18] sm:$0xff] }
 0x2be   :  { %s1025_s4 = spop %1024 }
 0x2bf   :  { %v409_v40 = vstv %s1025_s4  ;;  %s907_s4 = sshll.u32 %s1602_s7, 4  ;;  %s908_s4 = int_to_ptr.hbm [resolvable:$true] %s907_s4 }
 0x2c0   :  { %v424_v41 = vmul.f32 %v409_v40, %v329_v59  ;;  %v425_v16 = vmul.f32 %v409_v40, %v330_v63  ;;  %v422_v44 = vmul.f32 %v409_v40, %v327_v50  ;;  %v423_v45 = vmul.f32 %v409_v40, %v328_v53 }
 0x2c1   :  { %v420_v21 = vmul.f32 %v409_v40, %v1358_v42  ;;  %v421_v51 = vmul.f32 %v409_v40, %v1364_v47  ;;  %v418_v61 = vmul.f32 %v409_v40, %v1346_v33  ;;  %v419_v62 = vmul.f32 %v409_v40, %v1352_v39 }
 0x2c2   :  { %v440_v48 = vmul.f32 0.01, %v424_v41  ;;  %v441_v49 = vmul.f32 0.01, %v425_v16  ;;  %v438_v25 = vmul.f32 0.01, %v422_v44  ;;  %v416_v1 = vmul.f32 %v409_v40, %v1334_v27 }
 0x2c3   :  { %v439_v52 = vmul.f32 0.01, %v423_v45  ;;  %v436_v58 = vmul.f32 0.01, %v420_v21  ;;  %v437_v50 = vmul.f32 0.01, %v421_v51  ;;  %v417_v47 = vmul.f32 %v409_v40, %v1340_v5 }
 0x2c4   :  { %v456_v35 = vmax.f32 %v424_v41, %v440_v48  ;;  %v457_v54 = vmax.f32 %v425_v16, %v441_v49  ;;  %v454_v59 = vmax.f32 %v422_v44, %v438_v25  ;;  %v434_v42 = vmul.f32 0.01, %v418_v61  ;;  %v501_v41 = vpop.permute.xlu0 %500 }
 0x2c5   :  { %v455_v63 = vmax.f32 %v423_v45, %v439_v52  ;;  %v435_v53 = vmul.f32 0.01, %v419_v62  ;;  %v452_v3 = vmax.f32 %v420_v21, %v436_v58  ;;  %v453_v4 = vmax.f32 %v421_v51, %v437_v50 }
 0x2c6   :  { %v481_v34 = vpack.c.bf16 %v457_v54, %v456_v35  ;;  %v450_v33 = vmax.f32 %v418_v61, %v434_v42  ;;  %v432_v39 = vmul.f32 0.01, %v416_v1  ;;  %v433_v6 = vmul.f32 0.01, %v417_v47 }
 0x2c7   :  { %v480_v2 = vpack.c.bf16 %v455_v63, %v454_v59  ;;  %v451_v38 = vmax.f32 %v419_v62, %v435_v53  ;;  %v479_v7 = vpack.c.bf16 %v453_v4, %v452_v3  ;;  %v414_v8 = vmul.f32 %v409_v40, %v1322_v23  ;;  %v531_v3 = vpop.permute.xlu1 %530 }
 0x2c8   :  { %626 = vmatpush.bf16.msra.mxu1 %v481_v34  ;;  %1010 = vmatpush.bf16.msra.mxu3 %v481_v34  ;;  %v415_v10 = vmul.f32 %v409_v40, %v1327_v55  ;;  %v448_v27 = vmax.f32 %v416_v1, %v432_v39  ;;  %v449_v11 = vmax.f32 %v417_v47, %v433_v6 }
 0x2c9   :  { %v478_v43 = vpack.c.bf16 %v451_v38, %v450_v33  ;;  %v430_v5 = vmul.f32 0.01, %v414_v8  ;;  %v412_v20 = vmul.f32 %v409_v40, %v1312_v18  ;;  %v413_v46 = vmul.f32 %v409_v40, %v1315_v19 }
 0x2ca   :  { %v431_v13 = vmul.f32 0.01, %v415_v10  ;;  %v477_v14 = vpack.c.bf16 %v449_v11, %v448_v27  ;;  %v410_v22 = vmul.f32 %v409_v40, %v1306_v15  ;;  %v411_v23 = vmul.f32 %v409_v40, %v1309_v17  ;;  %v1001_v17 = vld [vmem:[%s1598_s3] sm:$0xff]  ;;  %v1008_v40 = vld [vmem:[%s1598_s3 + $0x38] sm:$0xff] }
 0x2cb   :  { %v446_v56 = vmax.f32 %v414_v8, %v430_v5  ;;  %v428_v57 = vmul.f32 0.01, %v412_v20  ;;  %v429_v60 = vmul.f32 0.01, %v413_v46 }
 0x2cc   :  { %627 = vmatpush.bf16.msra.mxu1 %v480_v2  ;;  %1011 = vmatpush.bf16.msra.mxu3 %v480_v2  ;;  %v447_v55 = vmax.f32 %v415_v10, %v431_v13  ;;  %v426_v24 = vmul.f32 0.01, %v410_v22  ;;  %v427_v18 = vmul.f32 0.01, %v411_v23  ;;  %v506_v16 = vpop.permute.xlu0 %505  ;;  %v526_v2 = vpop.permute.xlu2 %525 }
 0x2cd   :  { %v444_v0 = vmax.f32 %v412_v20, %v428_v57  ;;  %v445_v28 = vmax.f32 %v413_v46, %v429_v60 }
 0x2ce   :  { %v476_v26 = vpack.c.bf16 %v447_v55, %v446_v56  ;;  %v442_v29 = vmax.f32 %v410_v22, %v426_v24  ;;  %v443_v30 = vmax.f32 %v411_v23, %v427_v18 }
 0x2cf   :  { %v475_v19 = vpack.c.bf16 %v445_v28, %v444_v0  ;;  %v556_v60 = vpop.permute.xlu1 %555 }
 0x2d0   :  { %628 = vmatpush.bf16.msra.mxu1 %v479_v7  ;;  %1012 = vmatpush.bf16.msra.mxu3 %v479_v7  ;;  %v474_v15 = vpack.c.bf16 %v443_v30, %v442_v29 }
 0x2d4   :  { %629 = vmatpush.bf16.msra.mxu1 %v478_v43  ;;  %1013 = vmatpush.bf16.msra.mxu3 %v478_v43  ;;  %v511_v44 = vpop.permute.xlu0 %510  ;;  %v551_v22 = vpop.permute.xlu2 %550 }
 0x2d8   :  { %630 = vmatpush.bf16.msra.mxu1 %v477_v14  ;;  %1014 = vmatpush.bf16.msra.mxu3 %v477_v14 }
 0x2dc   :  { %631 = vmatpush.bf16.msra.mxu1 %v476_v26  ;;  %1015 = vmatpush.bf16.msra.mxu3 %v476_v26  ;;  %v516_v49 = vpop.permute.xlu0 %515 }
 0x2e0   :  { %632 = vmatpush.bf16.msra.mxu1 %v475_v19  ;;  %1016 = vmatpush.bf16.msra.mxu3 %v475_v19 }
 0x2e4   :  { %633 = vmatpush.bf16.msra.mxu1 %v474_v15  ;;  %1017 = vmatpush.bf16.msra.mxu3 %v474_v15  ;;  %v521_v52 = vpop.permute.xlu0 %520 }
 0x2e7   :  { %634 = vmatmul.bf16.vlgmr.msra.gmra.mxu1 %v1001_v17  ;;  %654 = vmatmul.bf16.vlgmr.msra.gmra.mxu3 %v1005_v31 }
 0x2ec   :  { %v536_v58 = vpop.permute.xlu0 %535 }
 0x2f4   :  { %v541_v59 = vpop.permute.xlu0 %540 }
 0x2f7   :  { %639 = vmatmul.bf16.gmra.mxu1 %v1002_v32  ;;  %659 = vmatmul.bf16.gmra.mxu3 %v1006_v9 }
 0x2fc   :  { %v546_v43 = vpop.permute.xlu0 %545 }
 0x304   :  { %v561_v18 = vpop.permute.xlu0 %560 }
 0x307   :  { %644 = vmatmul.bf16.gmra.mxu1 %v1003_v36  ;;  %664 = vmatmul.bf16.gmra.mxu3 %v1007_v37  ;;  %v566_v37 = vpop.permute.xlu2 %565 }
 0x317   :  { %649 = vmatmul.bf16.gmra.mxu1 %v1004_v12  ;;  %669 = vmatmul.bf16.gmra.mxu3 %v1008_v40 }
 0x364   :  { %v635_v45 = vpop.f32.mrf.mxu1 }
 0x365   :  { %v1433_v42 = vadd.f32 %v635_v45, %v501_v41 }
 0x367   :  { %v675_v4 = vsel %vm264_vm1, %v1433_v42, 0.0 }
 0x36a   :  { %v655_v21 = vpop.f32.mrf.mxu3 }
 0x36b   :  { %v1459_v55 = vadd.f32 %v655_v21, %v541_v59 }
 0x36c   :  { %v637_v48 = vpop.f32.mrf.mxu1 }
 0x36d   :  { %v1431_v50 = vadd.f32 %v637_v48, %v506_v16  ;;  %v690_v29 = vsel %vm264_vm1, %v1459_v55, 0.0  ;;  %v571_v16 = vpop.permute.xlu1 %570 }
 0x36f   :  { %v676_v1 = vsel %vm264_vm1, %v1431_v50, 0.0 }
 0x370   :  { %v677_v39 = vadd.f32 %v676_v1, %v675_v4 }
 0x372   :  { %v657_v25 = vpop.f32.mrf.mxu3 }
 0x373   :  { %v1463_v0 = vadd.f32 %v657_v25, %v546_v43 }
 0x374   :  { %v640_v51 = vpop.f32.mrf.mxu1 }
 0x375   :  { %v1435_v53 = vadd.f32 %v640_v51, %v511_v44  ;;  %v692_v17 = vsel %vm264_vm1, %v1463_v0, 0.0 }
 0x377   :  { %v678_v33 = vsel %vm264_vm1, %v1435_v53, 0.0 }
 0x378   :  { %v679_v27 = vadd.f32 %v678_v33, %v677_v39 }
 0x37a   :  { %v660_v35 = vpop.f32.mrf.mxu3 }
 0x37b   :  { %v1469_v30 = vadd.f32 %v660_v35, %v551_v22 }
 0x37c   :  { %v642_v54 = vpop.f32.mrf.mxu1 }
 0x37d   :  { %v1439_v47 = vadd.f32 %v642_v54, %v516_v49  ;;  %v694_v9 = vsel %vm264_vm1, %v1469_v30, 0.0  ;;  %v576_v49 = vpop.permute.xlu0 %575 }
 0x37f   :  { %v680_v8 = vsel %vm264_vm1, %v1439_v47, 0.0 }
 0x380   :  { %v681_v13 = vadd.f32 %v680_v8, %v679_v27 }
 0x382   :  { %v662_v61 = vpop.f32.mrf.mxu3 }
 0x383   :  { %v1473_v31 = vadd.f32 %v662_v61, %v556_v60 }
 0x384   :  { %v645_v62 = vpop.f32.mrf.mxu1 }
 0x385   :  { %v1445_v38 = vadd.f32 %v645_v62, %v521_v52  ;;  %v696_v40 = vsel %vm264_vm1, %v1473_v31, 0.0 }
 0x387   :  { %v682_v11 = vsel %vm264_vm1, %v1445_v38, 0.0 }
 0x388   :  { %v683_v46 = vadd.f32 %v682_v11, %v681_v13 }
 0x38a   :  { %v665_v34 = vpop.f32.mrf.mxu3 }
 0x38b   :  { %v1477_v36 = vadd.f32 %v665_v34, %v561_v18 }
 0x38c   :  { %v647_v63 = vpop.f32.mrf.mxu1 }
 0x38d   :  { %v1449_v10 = vadd.f32 %v647_v63, %v526_v2  ;;  %v698_v21 = vsel %vm264_vm1, %v1477_v36, 0.0 }
 0x38f   :  { %v684_v20 = vsel %vm264_vm1, %v1449_v10, 0.0 }
 0x390   :  { %v685_v23 = vadd.f32 %v684_v20, %v683_v46 }
 0x392   :  { %v667_v6 = vpop.f32.mrf.mxu3 }
 0x393   :  { %v1481_v41 = vadd.f32 %v667_v6, %v566_v37 }
 0x394   :  { %v650_v7 = vpop.f32.mrf.mxu1 }
 0x395   :  { %v1453_v5 = vadd.f32 %v650_v7, %v531_v3  ;;  %v700_v51 = vsel %vm264_vm1, %v1481_v41, 0.0 }
 0x397   :  { %v686_v14 = vsel %vm264_vm1, %v1453_v5, 0.0 }
 0x398   :  { %v687_v24 = vadd.f32 %v686_v14, %v685_v23 }
 0x39a   :  { %v670_v26 = vpop.f32.mrf.mxu3 }
 0x39b   :  { %v1485_v48 = vadd.f32 %v670_v26, %v571_v16 }
 0x39c   :  { %v652_v56 = vpop.f32.mrf.mxu1 }
 0x39d   :  { %v1461_v57 = vadd.f32 %v652_v56, %v536_v58  ;;  %v702_v54 = vsel %vm264_vm1, %v1485_v48, 0.0 }
 0x39f   :  { %v688_v28 = vsel %vm264_vm1, %v1461_v57, 0.0 }
 0x3a0   :  { %v689_v19 = vadd.f32 %v688_v28, %v687_v24 }
 0x3a2   :  { %v691_v15 = vadd.f32 %v690_v29, %v689_v19  ;;  %v672_v44 = vpop.f32.mrf.mxu3 }
 0x3a3   :  { %v1489_v52 = vadd.f32 %v672_v44, %v576_v49 }
 0x3a4   :  { %v693_v32 = vadd.f32 %v692_v17, %v691_v15 }
 0x3a5   :  { %v704_v61 = vsel %vm264_vm1, %v1489_v52, 0.0 }
 0x3a6   :  { %v695_v12 = vadd.f32 %v694_v9, %v693_v32 }
 0x3a8   :  { %v697_v45 = vadd.f32 %v696_v40, %v695_v12 }
 0x3aa   :  { %v699_v25 = vadd.f32 %v698_v21, %v697_v45 }
 0x3ac   :  { %v701_v35 = vadd.f32 %v700_v51, %v699_v25 }
 0x3ae   :  { %v703_v58 = vadd.f32 %v702_v54, %v701_v35 }
 0x3b0   :  { %v705_v62 = vadd.f32 %v704_v61, %v703_v58 }
 0x3b2   :  { %706 = vadd.xlane.f32.xlu2 %v705_v62 }
 0x425   :  { %v707_v34 = vpop.xlane.xlu2 %706 }
 0x426   :  { %v708_v59 = vrot.slane %v707_v34, 4 }
 0x428   :  { %v709_v63 = vadd.f32 %v708_v59, %v707_v34 }
 0x42a   :  { %v710_v1 = vrot.slane %v709_v63, 2 }
 0x42c   :  { %v711_v2 = vadd.f32 %v710_v1, %v709_v63 }
 0x42e   :  { %v712_v3 = vrot.slane %v711_v2, 1 }
 0x430   :  { %v713_v4 = vadd.f32 %v712_v3, %v711_v2 }
 0x432   :  { %1026 = vpush %v713_v4 }
 0x463   :  { %s1027_s3 = spop %1026 }
 0x464   :  { %s723_s27 = smul.f32 %s1027_s3, %s1302_s26 }
 0x466   :  { %v724_v33 = vstv %s723_s27 }
 0x467   :  { %v1497_v39 = vsub.f32 %v1433_v42, %v724_v33  ;;  %v1500_v6 = vsub.f32 %v1431_v50, %v724_v33  ;;  %v1503_v7 = vsub.f32 %v1435_v53, %v724_v33  ;;  %v1506_v8 = vsub.f32 %v1439_v47, %v724_v33 }
 0x468   :  { %v1513_v11 = vsub.f32 %v1445_v38, %v724_v33  ;;  %v1518_v50 = vsub.f32 %v1449_v10, %v724_v33  ;;  %v1525_v46 = vsub.f32 %v1453_v5, %v724_v33  ;;  %v1531_v10 = vsub.f32 %v1461_v57, %v724_v33 }
 0x469   :  { %v741_v43 = vmul.f32 %v1497_v39, %v1497_v39  ;;  %v742_v27 = vmul.f32 %v1500_v6, %v1500_v6  ;;  %v743_v42 = vmul.f32 %v1503_v7, %v1503_v7  ;;  %v744_v53 = vmul.f32 %v1506_v8, %v1506_v8 }
 0x46a   :  { %v745_v38 = vmul.f32 %v1513_v11, %v1513_v11  ;;  %v746_v23 = vmul.f32 %v1518_v50, %v1518_v50  ;;  %v1537_v24 = vsub.f32 %v1459_v55, %v724_v33  ;;  %v747_v5 = vmul.f32 %v1525_v46, %v1525_v46 }
 0x46b   :  { %v757_v47 = vsel %vm264_vm1, %v741_v43, 0.0  ;;  %v758_v13 = vsel %vm264_vm1, %v742_v27, 0.0  ;;  %v760_v14 = vsel %vm264_vm1, %v743_v42, 0.0  ;;  %v762_v56 = vsel %vm264_vm1, %v744_v53, 0.0 }
 0x46c   :  { %v759_v20 = vadd.f32 %v758_v13, %v757_v47  ;;  %v764_v26 = vsel %vm264_vm1, %v745_v38, 0.0  ;;  %v1543_v18 = vsub.f32 %v1463_v0, %v724_v33  ;;  %v748_v57 = vmul.f32 %v1531_v10, %v1531_v10 }
 0x46d   :  { %v766_v19 = vsel %vm264_vm1, %v746_v23, 0.0  ;;  %v1549_v15 = vsub.f32 %v1469_v30, %v724_v33  ;;  %v749_v55 = vmul.f32 %v1537_v24, %v1537_v24  ;;  %v768_v17 = vsel %vm264_vm1, %v747_v5, 0.0 }
 0x46e   :  { %v761_v22 = vadd.f32 %v760_v14, %v759_v20  ;;  %v1555_v9 = vsub.f32 %v1473_v31, %v724_v33  ;;  %v750_v0 = vmul.f32 %v1543_v18, %v1543_v18  ;;  %v770_v37 = vsel %vm264_vm1, %v748_v57, 0.0 }
 0x46f   :  { %v737_v40 = vsub.f32 %v1477_v36, %v724_v33  ;;  %v751_v30 = vmul.f32 %v1549_v15, %v1549_v15  ;;  %v772_v16 = vsel %vm264_vm1, %v749_v55, 0.0  ;;  %v738_v45 = vsub.f32 %v1481_v41, %v724_v33 }
 0x470   :  { %v763_v60 = vadd.f32 %v762_v56, %v761_v22  ;;  %v752_v31 = vmul.f32 %v1555_v9, %v1555_v9  ;;  %v774_v21 = vsel %vm264_vm1, %v750_v0, 0.0  ;;  %v739_v25 = vsub.f32 %v1485_v48, %v724_v33 }
 0x471   :  { %v753_v51 = vmul.f32 %v737_v40, %v737_v40  ;;  %v776_v35 = vsel %vm264_vm1, %v751_v30, 0.0  ;;  %v740_v54 = vsub.f32 %v1489_v52, %v724_v33  ;;  %v754_v58 = vmul.f32 %v738_v45, %v738_v45 }
 0x472   :  { %v765_v28 = vadd.f32 %v764_v26, %v763_v60  ;;  %v778_v61 = vsel %vm264_vm1, %v752_v31, 0.0  ;;  %v755_v34 = vmul.f32 %v739_v25, %v739_v25 }
 0x473   :  { %v780_v41 = vsel %vm264_vm1, %v753_v51, 0.0  ;;  %v756_v63 = vmul.f32 %v740_v54, %v740_v54  ;;  %v782_v1 = vsel %vm264_vm1, %v754_v58, 0.0 }
 0x474   :  { %v767_v29 = vadd.f32 %v766_v19, %v765_v28  ;;  %v784_v48 = vsel %vm264_vm1, %v755_v34, 0.0 }
 0x475   :  { %v786_v4 = vsel %vm264_vm1, %v756_v63, 0.0 }
 0x476   :  { %v769_v32 = vadd.f32 %v768_v17, %v767_v29 }
 0x478   :  { %v771_v12 = vadd.f32 %v770_v37, %v769_v32 }
 0x47a   :  { %v773_v44 = vadd.f32 %v772_v16, %v771_v12 }
 0x47c   :  { %v775_v49 = vadd.f32 %v774_v21, %v773_v44 }
 0x47e   :  { %v777_v36 = vadd.f32 %v776_v35, %v775_v49 }
 0x480   :  { %v779_v62 = vadd.f32 %v778_v61, %v777_v36 }
 0x482   :  { %v781_v59 = vadd.f32 %v780_v41, %v779_v62 }
 0x484   :  { %v783_v2 = vadd.f32 %v782_v1, %v781_v59 }
 0x486   :  { %v785_v3 = vadd.f32 %v784_v48, %v783_v2 }
 0x488   :  { %v787_v43 = vadd.f32 %v786_v4, %v785_v3 }
 0x48a   :  { %788 = vadd.xlane.f32.xlu1 %v787_v43 }
 0x4fd   :  { %v789_v52 = vpop.xlane.xlu1 %788 }
 0x4fe   :  { %v790_v33 = vrot.slane %v789_v52, 4 }
 0x500   :  { %v791_v27 = vadd.f32 %v790_v33, %v789_v52 }
 0x502   :  { %v792_v42 = vrot.slane %v791_v27, 2 }
 0x504   :  { %v793_v53 = vadd.f32 %v792_v42, %v791_v27 }
 0x506   :  { %v794_v47 = vrot.slane %v793_v53, 1 }
 0x508   :  { %v795_v13 = vadd.f32 %v794_v47, %v793_v53 }
 0x50a   :  { %1028 = vpush %v795_v13 }
 0x53b   :  { %s1029_s28 = spop %1028 }
 0x53c   :  { %s805_s29 = smul.f32 %s1029_s28, %s1302_s26 }
 0x53e   :  { %s806_s30 = sadd.f32 1e-05, %s805_s29 }
 0x540   :  { %v807_v20 = vstv %s806_s30 }
 0x541   :  { %1042 = vrsqrt.f32 %v807_v20  ;;  %vm814_vm7 = vweird.f32 %v807_v20 }
 0x547   :  { %v1043_v38 = vpop.eup %1042 }
 0x548   :  { %v809_v14 = vmul.f32 %v1043_v38, %v807_v20  ;;  %vm815_vm6 = vweird.f32 %v1043_v38 }
 0x549   :  { %vm816_vm8 = vmor %vm814_vm7, %vm815_vm6 }
 0x54a   :  { %v810_v22 = vmul.f32 %v1043_v38, %v809_v14 }
 0x54c   :  { %v811_v23 = vmul.f32 0.5, %v810_v22  ;;  %v894_v22 = vpop.permute.xlu0 %893 }
 0x54e   :  { %v812_v56 = vsub.f32 1.5, %v811_v23 }
 0x550   :  { %v813_v60 = vmul.f32 %v1043_v38, %v812_v56 }
 0x552   :  { %v817_v5 = vsel %vm816_vm8, %v1043_v38, %v813_v60 }
 0x553   :  { %1030 = vpush %v817_v5 }
 0x584   :  { %s1031_s8 = spop %1030 }
 0x585   :  { %v819_v26 = vstv %s1031_s8 }
 0x586   :  { %v834_v28 = vmul.f32 %v819_v26, %v739_v25  ;;  %v835_v57 = vmul.f32 %v819_v26, %v740_v54  ;;  %v832_v19 = vmul.f32 %v819_v26, %v737_v40  ;;  %v833_v29 = vmul.f32 %v819_v26, %v738_v45 }
 0x587   :  { %v830_v55 = vmul.f32 %v819_v26, %v1549_v15  ;;  %v831_v37 = vmul.f32 %v819_v26, %v1555_v9  ;;  %v828_v31 = vmul.f32 %v819_v26, %v1537_v24  ;;  %v829_v21 = vmul.f32 %v819_v26, %v1543_v18 }
 0x588   :  { %v850_v17 = vmul.f32 0.01, %v834_v28  ;;  %v851_v32 = vmul.f32 0.01, %v835_v57  ;;  %v848_v0 = vmul.f32 0.01, %v832_v19  ;;  %v826_v15 = vmul.f32 %v819_v26, %v1525_v46 }
 0x589   :  { %v849_v12 = vmul.f32 0.01, %v833_v29  ;;  %v846_v44 = vmul.f32 0.01, %v830_v55  ;;  %v847_v40 = vmul.f32 0.01, %v831_v37  ;;  %v827_v35 = vmul.f32 %v819_v26, %v1531_v10 }
 0x58a   :  { %v866_v30 = vmax.f32 %v834_v28, %v850_v17  ;;  %v867_v16 = vmax.f32 %v835_v57, %v851_v32  ;;  %v864_v25 = vmax.f32 %v832_v19, %v848_v0  ;;  %v844_v45 = vmul.f32 0.01, %v828_v31 }
 0x58b   :  { %v865_v51 = vmax.f32 %v833_v29, %v849_v12  ;;  %v862_v9 = vmax.f32 %v830_v55, %v846_v44  ;;  %v863_v54 = vmax.f32 %v831_v37, %v847_v40  ;;  %v845_v58 = vmul.f32 0.01, %v829_v21 }
 0x58c   :  { %v876_v49 = vpack.c.bf16 %v867_v16, %v866_v30  ;;  %v860_v61 = vmax.f32 %v828_v31, %v844_v45  ;;  %v842_v62 = vmul.f32 0.01, %v826_v15  ;;  %v843_v24 = vmul.f32 0.01, %v827_v35 }
 0x58d   :  { %v875_v36 = vpack.c.bf16 %v865_v51, %v864_v25  ;;  %v874_v34 = vpack.c.bf16 %v863_v54, %v862_v9  ;;  %v861_v18 = vmax.f32 %v829_v21, %v845_v58  ;;  %v824_v41 = vmul.f32 %v819_v26, %v1513_v11 }
 0x58e   :  { %877 = vmatpush.bf16.msrb.mxu2 %v876_v49  ;;  %v825_v59 = vmul.f32 %v819_v26, %v1518_v50  ;;  %v858_v63 = vmax.f32 %v826_v15, %v842_v62  ;;  %v859_v1 = vmax.f32 %v827_v35, %v843_v24  ;;  %v822_v46 = vmul.f32 %v819_v26, %v1503_v7 }
 0x58f   :  { %v873_v10 = vpack.c.bf16 %v861_v18, %v860_v61  ;;  %v840_v2 = vmul.f32 0.01, %v824_v41  ;;  %v823_v3 = vmul.f32 %v819_v26, %v1506_v8  ;;  %v820_v52 = vmul.f32 %v819_v26, %v1497_v39  ;;  %v868_v39 = vld [vmem:[%s1600_s5] sm:$0xf] }
 0x590   :  { %v841_v48 = vmul.f32 0.01, %v825_v59  ;;  %v872_v4 = vpack.c.bf16 %v859_v1, %v858_v63  ;;  %v838_v43 = vmul.f32 0.01, %v822_v46  ;;  %v821_v50 = vmul.f32 %v819_v26, %v1500_v6 }
 0x591   :  { %v856_v33 = vmax.f32 %v824_v41, %v840_v2  ;;  %v839_v11 = vmul.f32 0.01, %v823_v3  ;;  %v836_v42 = vmul.f32 0.01, %v820_v52  ;;  %v896_v6 = vperm.slane %v894_v22, 0 }
 0x592   :  { %878 = vmatpush.bf16.msrb.mxu2 %v875_v36  ;;  %v857_v27 = vmax.f32 %v825_v59, %v841_v48  ;;  %v854_v47 = vmax.f32 %v822_v46, %v838_v43  ;;  %v837_v13 = vmul.f32 0.01, %v821_v50 }
 0x593   :  { %v855_v7 = vmax.f32 %v823_v3, %v839_v11  ;;  %v852_v38 = vmax.f32 %v820_v52, %v836_v42 }
 0x594   :  { %v871_v53 = vpack.c.bf16 %v857_v27, %v856_v33  ;;  %v853_v8 = vmax.f32 %v821_v50, %v837_v13 }
 0x595   :  { %v870_v20 = vpack.c.bf16 %v855_v7, %v854_v47 }
 0x596   :  { %879 = vmatpush.bf16.msrb.mxu2 %v874_v34  ;;  %v869_v14 = vpack.c.bf16 %v853_v8, %v852_v38 }
 0x59a   :  { %880 = vmatpush.bf16.msrb.mxu2 %v873_v10 }
 0x59e   :  { %881 = vmatpush.bf16.msrb.mxu2 %v872_v4 }
 0x5a2   :  { %882 = vmatpush.bf16.msrb.mxu2 %v871_v53 }
 0x5a6   :  { %883 = vmatpush.bf16.msrb.mxu2 %v870_v20 }
 0x5aa   :  { %884 = vmatpush.bf16.msrb.mxu2 %v869_v14 }
 0x5ad   :  { %885 = vmatmul.bf16.vlgmr.msrb.gmra.mxu2 %v868_v39 }
 0x630   :  { %v886_v23 = vpop.f32.mrf.mxu2 }
 0x631   :  { %v897_v56 = vadd.f32 %v896_v6, %v886_v23 }
 0x633   :  { %899 = vst.msk [vmem:[#allocation3] sm:$0x1] %vm898_vm9, %v897_v56 }
 0x634   :  { %910 = dma.vmem_to_hbm [thread:$0]  %s906_s10, 16, %s908_s4, [#allocation4]  }
 0x638   :  { %v888_v60 = vpop.f32.mrf.mxu2 }
 0x639   :  { %1068 = dma.done.wait [#allocation4], 16  }
 0x63a   :  { %1069 = vsyncadd [#allocation4], 4294967280 }
 0x63b   :  { %915 = vsyncpa [#allocation4], 1 }

</bundles_post_ra>
